<compile_context>
chip_gen: v5e
topology: v5e:2x2
jax: 0.10.0
libtpu: 0.0.40
codegen_flags: <defaults>
</compile_context>

<pallas_src>
import functools

import jax
import jax.numpy as jnp
from jax.experimental import pallas as pl
from jax.experimental.pallas import tpu as pltpu


# ----------------------------- schedules (glue) -----------------------------
def ddpm_schedules(beta1, beta2, T):
    assert beta1 < beta2 < 1.0
    t = jnp.arange(0, T + 1, dtype=jnp.float32)
    beta_t = (beta2 - beta1) * t / T + beta1
    alpha_t = 1.0 - beta_t
    log_alpha_t = jnp.log(alpha_t)
    alphabar_t = jnp.exp(jnp.cumsum(log_alpha_t))
    return {
        "alpha_t": alpha_t,
        "oneover_sqrta": 1.0 / jnp.sqrt(alpha_t),
        "sqrt_beta_t": jnp.sqrt(beta_t),
        "alphabar_t": alphabar_t,
        "sqrtab": jnp.sqrt(alphabar_t),
        "sqrtmab": jnp.sqrt(1.0 - alphabar_t),
        "mab_over_sqrtmab": (1.0 - alpha_t) / jnp.sqrt(1.0 - alphabar_t),
    }


# ------------------------------- Pallas kernel ------------------------------
def _ddpm_loss_kernel(
    x_ref,        # VMEM (C, TB*HW)      lane-dense image block, f32
    noise_ref,    # VMEM (C, TB*HW)      lane-dense noise block, f32
    scl_ref,      # VMEM (2, TB*HW)      row 0: sqrt(abar_t), row 1: sqrt(1-abar_t)
    emb_ref,      # VMEM (1, hidden, TB) per-image FiLM embedding columns
    w1_ref,       # VMEM (hidden, C)     resident weights
    w2_ref,       # VMEM (C, hidden)     resident weights
    out_ref,      # VMEM (1, C, 128)     per-block partial sum of (noise-eps)^2
    h_ref,        # VMEM scratch (hidden, TB*HW) f32
    *, tb, hw,
):
    x = x_ref[...]
    noise = noise_ref[...]

    # Forward diffusion (q-sample): x_t = sqrtab[t]*x + sqrtmab[t]*noise.
    # Scales are pre-expanded lane rows -> pure full-width VPU FMAs, no SMEM
    # scalar reads and no lane concatenates.
    x_t = scl_ref[0:1, :] * x + scl_ref[1:2, :] * noise            # (C, TB*HW)

    # Layer 1 on the MXU in f32 (cast-free; K = C is tiny and the MXU is
    # otherwise idle, so the old bf16 casts were pure VPU cost).
    h_ref[...] = jnp.dot(w1_ref[...], x_t, preferred_element_type=jnp.float32)

    # FiLM conditioning + GELU: one static lane slice per image, lane-broadcast
    # of a (hidden, 1) column (no second full-width temporary, no concat).
    emb = emb_ref[0]                                               # (hidden, TB)
    for i in range(tb):
        sl = slice(i * hw, (i + 1) * hw)
        h_ref[:, sl] = jax.nn.gelu(h_ref[:, sl] + emb[:, i:i + 1])

    # Layer 2 on the MXU in f32: eps prediction.
    eps = jnp.dot(w2_ref[...], h_ref[...], preferred_element_type=jnp.float32)

    # Fused residual + squared error, reduced into a (C, 128) lane-chunk
    # accumulator.  Per-block independent output -> no cross-step carry.
    c = eps.shape[0]
    acc = jnp.zeros((c, 128), jnp.float32)
    for k in range(eps.shape[1] // 128):
        d = noise[:, k * 128:(k + 1) * 128] - eps[:, k * 128:(k + 1) * 128]
        acc = acc + d * d
    out_ref[...] = acc[None]


# ------------------------------ wrapper (glue) -------------------------------
def _pick_batch_tile(B, C, HW, target_bytes=1 << 20):
    """Largest divisor of B such that one grid step streams <= target bytes of
    x + noise + scale rows, while keeping nb >= 2 (pipelining / v7x megacore)."""
    per_img = (2 * C + 2) * HW * 4
    cap = max(1, target_bytes // per_img)
    if B > 1:
        cap = min(cap, B // 2)
    tb = 1
    for d in range(1, B + 1):
        if B % d == 0 and d <= cap:
            tb = d
    return tb


def prepare_inputs(sched, x, c, key, n_T, n_classes, drop_prob):
    """Mirror the torch forward(): sample t, noise, context mask.

    The streamed tensors are produced directly in the lane-dense (C, B, HW)
    layout the kernel wants: noise is drawn in that layout, x is re-laid-out
    once here at the upstream producer, so the kernel wrapper itself does only
    free reshapes (no extra HBM transpose pass at call time).
    """
    B, C, H, W = x.shape
    HW = H * W
    k_ts, k_noise, k_mask = jax.random.split(key, 3)

    ts = jax.random.randint(k_ts, (B,), 1, n_T + 1)                     # 1..n_T
    noise_cd = jax.random.normal(k_noise, (C, B, HW), dtype=jnp.float32)
    context_mask = jax.random.bernoulli(k_mask, drop_prob, (B,)).astype(jnp.float32)

    # TODO(synk): in a real pipeline x would arrive in (C, B, HW) layout from
    # the data loader; this one-time re-layout stands in for that.
    x_cd = jnp.transpose(x.reshape(B, C, HW), (1, 0, 2)).astype(jnp.float32)

    return {
        "x_cd": x_cd,
        "noise_cd": noise_cd,
        "sab_ts": sched["sqrtab"][ts].astype(jnp.float32),
        "smab_ts": sched["sqrtmab"][ts].astype(jnp.float32),
        "t_frac": ts.astype(jnp.float32) / float(n_T),
        # classifier-free-guidance context dropping: one_hot(c) * (1 - mask)
        "cond": jax.nn.one_hot(c, n_classes, dtype=jnp.float32)
                * (1.0 - context_mask)[:, None],
    }


def ddpm_loss_pallas(params, inputs, *, batch_tile=None):
    x_cd = inputs["x_cd"]              # (C, B, HW) f32, lane-dense upstream layout
    noise_cd = inputs["noise_cd"]      # (C, B, HW)
    C, B, HW = x_cd.shape
    hidden = params["w1T"].shape[0]

    assert HW % 128 == 0, "per-image pixel count must be a multiple of 128"
    tb = batch_tile if batch_tile is not None else _pick_batch_tile(B, C, HW)
    assert B % tb == 0, "batch must be divisible by the batch tile"
    nb = B // tb
    n_step = tb * HW

    # Free reshapes only — no HBM transpose of the streamed tensors here.
    x2 = x_cd.reshape(C, B * HW)
    n2 = noise_cd.reshape(C, B * HW)

    # Pre-expanded q-sample scale rows (2, B*HW): lane n -> image n // HW.
    scl = jnp.stack(
        [jnp.repeat(inputs["sab_ts"], HW), jnp.repeat(inputs["smab_ts"], HW)],
        axis=0)

    # FiLM conditioning embedding hoisted out of the kernel:
    #   emb = relu(Wc @ cond + t_frac * wt + b)  -> (hidden, B), one padded
    # (hidden, tb) tile per grid step (instead of tb separate (hidden, 1) tiles).
    emb_hb = jnp.maximum(
        jnp.einsum("hk,bk->hb", params["wcT"], inputs["cond"])
        + inputs["t_frac"][None, :] * params["wtT"]
        + params["beT"],
        0.0)
    emb_blk = emb_hb.reshape(hidden, nb, tb).transpose(1, 0, 2)     # (nb, hidden, tb)

    # VMEM budget: double-buffered streamed blocks + h scratch + residents.
    stream_bytes = (2 * C + 2) * n_step * 4
    scratch_bytes = hidden * n_step * 4
    resident_bytes = (2 * hidden * C + hidden * 128 + 8 * 128) * 4
    vmem_limit = int(min(max(2 * stream_bytes + scratch_bytes + resident_bytes
                             + (2 << 20), 32 << 20), 48 << 20))

    kernel = functools.partial(_ddpm_loss_kernel, tb=tb, hw=HW)

    partials = pl.pallas_call(
        kernel,
        out_shape=jax.ShapeDtypeStruct((nb, C, 128), jnp.float32),
        grid_spec=pltpu.PrefetchScalarGridSpec(
            num_scalar_prefetch=0,
            grid=(nb,),
            in_specs=[
                pl.BlockSpec((C, n_step), lambda b: (0, b)),          # x (lane-dense)
                pl.BlockSpec((C, n_step), lambda b: (0, b)),          # noise
                pl.BlockSpec((2, n_step), lambda b: (0, b)),          # scale rows
                pl.BlockSpec((1, hidden, tb), lambda b: (b, 0, 0)),   # FiLM emb
                pl.BlockSpec((hidden, C), lambda b: (0, 0)),          # W1 (resident)
                pl.BlockSpec((C, hidden), lambda b: (0, 0)),          # W2 (resident)
            ],
            out_specs=pl.BlockSpec((1, C, 128), lambda b: (b, 0, 0)),
            scratch_shapes=[pltpu.VMEM((hidden, n_step), jnp.float32)],
        ),
        compiler_params=pltpu.CompilerParams(
            dimension_semantics=("parallel",),
            vmem_limit_bytes=vmem_limit,
        ),
    )(x2, n2, scl, emb_blk, params["w1T"], params["w2T"])

    return jnp.sum(partials) / (B * C * HW)


def reference_loss(params, inputs):
    """Pure-JAX f32 reference for correctness checking."""
    x = inputs["x_cd"]                 # (C, B, HW)
    noise = inputs["noise_cd"]
    sab = inputs["sab_ts"][None, :, None]
    smab = inputs["smab_ts"][None, :, None]
    x_t = sab * x + smab * noise
    emb = jnp.maximum(
        jnp.einsum("hk,bk->hb", params["wcT"], inputs["cond"])
        + inputs["t_frac"][None, :] * params["wtT"] + params["beT"], 0.0)
    h = jax.nn.gelu(
        jnp.einsum("hc,cbp->hbp", params["w1T"], x_t, precision="highest")
        + emb[:, :, None])
    eps = jnp.einsum("ch,hbp->cbp", params["w2T"], h, precision="highest")
    return jnp.mean((noise - eps) ** 2)


def init_params(key, C, hidden, n_classes):
    k1, k2, k3, k4 = jax.random.split(key, 4)
    s = 0.1
    return {
        "wcT": s * jax.random.normal(k1, (hidden, n_classes), jnp.float32),
        "wtT": s * jax.random.normal(k2, (hidden, 1), jnp.float32),
        "beT": jnp.zeros((hidden, 1), jnp.float32),
        "w1T": s * jax.random.normal(k3, (hidden, C), jnp.float32),
        "w2T": s * jax.random.normal(k4, (C, hidden), jnp.float32),
    }


if __name__ == "__main__":
    B, C, H, W = 8, 4, 16, 16
    n_T, n_classes, hidden = 400, 10, 32
    drop_prob = 0.1
    betas = (1e-4, 0.02)

    key = jax.random.PRNGKey(0)
    kp, kx, kc, kfwd = jax.random.split(key, 4)

    params = init_params(kp, C, hidden, n_classes)
    sched = ddpm_schedules(betas[0], betas[1], n_T)

    x = jax.random.normal(kx, (B, C, H, W), dtype=jnp.float32)
    c = jax.random.randint(kc, (B,), 0, n_classes)

    inputs = prepare_inputs(sched, x, c, kfwd, n_T, n_classes, drop_prob)

    loss = jax.block_until_ready(ddpm_loss_pallas(params, inputs))
    ref = jax.block_until_ready(reference_loss(params, inputs))

    assert jnp.isfinite(loss), loss
    assert jnp.allclose(loss, ref, rtol=5e-3, atol=1e-6), (loss, ref)

    print("KERNEL_OK")
</pallas_src>

<mosaic_0001>
module attributes {stable_mosaic.version = 11 : i64} {
  func.func @_ddpm_loss_kernel(%arg0: i32, %arg1: memref<4x1024xf32, #tpu.memory_space<vmem>>, %arg2: memref<4x1024xf32, #tpu.memory_space<vmem>>, %arg3: memref<2x1024xf32, #tpu.memory_space<vmem>>, %arg4: memref<1x32x4xf32, #tpu.memory_space<vmem>>, %arg5: memref<32x4xf32, #tpu.memory_space<vmem>>, %arg6: memref<4x32xf32, #tpu.memory_space<vmem>>, %arg7: memref<1x4x128xf32, #tpu.memory_space<vmem>>, %arg8: memref<32x1024xf32, #tpu.memory_space<vmem>>) attributes {dimension_semantics = [#tpu.dimension_semantics<parallel>], iteration_bounds = array<i64: 2>, scalar_prefetch = 0 : i64, scratch_operands = 1 : i64, tpu.core_type = #tpu.core_type<tc>, window_params = [{transform_indices = @transform_0, window_bounds = array<i64: 4, 1024>}, {transform_indices = @transform_1, window_bounds = array<i64: 4, 1024>}, {transform_indices = @transform_2, window_bounds = array<i64: 2, 1024>}, {transform_indices = @transform_3, window_bounds = array<i64: 1, 32, 4>}, {pipeline_mode = #tpu.pipeline_mode<synchronous>, transform_indices = @transform_4, window_bounds = array<i64: 32, 4>}, {pipeline_mode = #tpu.pipeline_mode<synchronous>, transform_indices = @transform_5, window_bounds = array<i64: 4, 32>}, {transform_indices = @transform_6, window_bounds = array<i64: 1, 4, 128>}]} {
    %c0 = arith.constant 0 : index
    %c0_0 = arith.constant 0 : index
    %0 = vector.load %arg1[%c0, %c0_0] : memref<4x1024xf32, #tpu.memory_space<vmem>>, vector<4x1024xf32>
    %c0_1 = arith.constant 0 : index
    %c0_2 = arith.constant 0 : index
    %1 = vector.load %arg2[%c0_1, %c0_2] : memref<4x1024xf32, #tpu.memory_space<vmem>>, vector<4x1024xf32>
    %c0_3 = arith.constant 0 : index
    %c0_4 = arith.constant 0 : index
    %2 = vector.load %arg3[%c0_3, %c0_4] : memref<2x1024xf32, #tpu.memory_space<vmem>>, vector<1x1024xf32>
    %3 = vector.broadcast %2 : vector<1x1024xf32> to vector<4x1024xf32>
    %4 = arith.mulf %3, %0 : vector<4x1024xf32>
    %c1 = arith.constant 1 : index
    %c0_5 = arith.constant 0 : index
    %5 = vector.load %arg3[%c1, %c0_5] : memref<2x1024xf32, #tpu.memory_space<vmem>>, vector<1x1024xf32>
    %6 = vector.broadcast %5 : vector<1x1024xf32> to vector<4x1024xf32>
    %7 = arith.mulf %6, %1 : vector<4x1024xf32>
    %8 = arith.addf %4, %7 : vector<4x1024xf32>
    %c0_6 = arith.constant 0 : index
    %c0_7 = arith.constant 0 : index
    %9 = vector.load %arg5[%c0_6, %c0_7] : memref<32x4xf32, #tpu.memory_space<vmem>>, vector<32x4xf32>
    %cst = arith.constant dense<0.000000e+00> : vector<32x1024xf32>
    %10 = tpu.matmul %9, %8, %cst {dimension_numbers = #tpu.dot_dimension_numbers<[1], [0], [0], [1], [0, 0, 1, 1], [], []>} : vector<32x4xf32>, vector<4x1024xf32>, vector<32x1024xf32> -> vector<32x1024xf32>
    %c0_8 = arith.constant 0 : index
    %c0_9 = arith.constant 0 : index
    %11 = vector.load %arg8[%c0_8, %c0_9] : memref<32x1024xf32, #tpu.memory_space<vmem>>, vector<32x1024xf32>
    tpu.vector_store %arg8[%c0_8, %c0_9], %10 {strides = array<i32>} : memref<32x1024xf32, #tpu.memory_space<vmem>>, vector<32x1024xf32>,
    %c0_10 = arith.constant 0 : index
    %c0_11 = arith.constant 0 : index
    %c0_12 = arith.constant 0 : index
    %12 = vector.load %arg4[%c0_10, %c0_11, %c0_12] : memref<1x32x4xf32, #tpu.memory_space<vmem>>, vector<1x32x4xf32>
    %13 = vector.shape_cast %12 : vector<1x32x4xf32> to vector<32x4xf32>
    %c0_13 = arith.constant 0 : index
    %c0_14 = arith.constant 0 : index
    %14 = vector.load %arg8[%c0_13, %c0_14] : memref<32x1024xf32, #tpu.memory_space<vmem>>, vector<32x256xf32>
    %15 = vector.extract_strided_slice %13 {offsets = [0, 0], sizes = [32, 1], strides = [1, 1]} : vector<32x4xf32> to vector<32x1xf32>
    %16 = vector.broadcast %15 : vector<32x1xf32> to vector<32x256xf32>
    %17 = arith.addf %14, %16 : vector<32x256xf32>
    %18 = arith.mulf %17, %17 : vector<32x256xf32>
    %19 = arith.mulf %17, %18 : vector<32x256xf32>
    %cst_15 = arith.constant 4.471500e-02 : f32
    %20 = vector.broadcast %cst_15 : f32 to vector<32x256xf32>
    %21 = arith.mulf %20, %19 : vector<32x256xf32>
    %22 = arith.addf %17, %21 : vector<32x256xf32>
    %cst_16 = arith.constant 0.797884583 : f32
    %23 = vector.broadcast %cst_16 : f32 to vector<32x256xf32>
    %24 = arith.mulf %23, %22 : vector<32x256xf32>
    %25 = math.tanh %24 : vector<32x256xf32>
    %cst_17 = arith.constant 1.000000e+00 : f32
    %26 = vector.broadcast %cst_17 : f32 to vector<32x256xf32>
    %27 = arith.addf %26, %25 : vector<32x256xf32>
    %cst_18 = arith.constant 5.000000e-01 : f32
    %28 = vector.broadcast %cst_18 : f32 to vector<32x256xf32>
    %29 = arith.mulf %28, %27 : vector<32x256xf32>
    %30 = arith.mulf %17, %29 : vector<32x256xf32>
    %c0_19 = arith.constant 0 : index
    %c0_20 = arith.constant 0 : index
    %31 = vector.load %arg8[%c0_19, %c0_20] : memref<32x1024xf32, #tpu.memory_space<vmem>>, vector<32x256xf32>
    tpu.vector_store %arg8[%c0_19, %c0_20], %30 {strides = array<i32>} : memref<32x1024xf32, #tpu.memory_space<vmem>>, vector<32x256xf32>,
    %c0_21 = arith.constant 0 : index
    %c256 = arith.constant 256 : index
    %32 = vector.load %arg8[%c0_21, %c256] : memref<32x1024xf32, #tpu.memory_space<vmem>>, vector<32x256xf32>
    %33 = vector.extract_strided_slice %13 {offsets = [0, 1], sizes = [32, 1], strides = [1, 1]} : vector<32x4xf32> to vector<32x1xf32>
    %34 = vector.broadcast %33 : vector<32x1xf32> to vector<32x256xf32>
    %35 = arith.addf %32, %34 : vector<32x256xf32>
    %36 = arith.mulf %35, %35 : vector<32x256xf32>
    %37 = arith.mulf %35, %36 : vector<32x256xf32>
    %cst_22 = arith.constant 4.471500e-02 : f32
    %38 = vector.broadcast %cst_22 : f32 to vector<32x256xf32>
    %39 = arith.mulf %38, %37 : vector<32x256xf32>
    %40 = arith.addf %35, %39 : vector<32x256xf32>
    %cst_23 = arith.constant 0.797884583 : f32
    %41 = vector.broadcast %cst_23 : f32 to vector<32x256xf32>
    %42 = arith.mulf %41, %40 : vector<32x256xf32>
    %43 = math.tanh %42 : vector<32x256xf32>
    %cst_24 = arith.constant 1.000000e+00 : f32
    %44 = vector.broadcast %cst_24 : f32 to vector<32x256xf32>
    %45 = arith.addf %44, %43 : vector<32x256xf32>
    %cst_25 = arith.constant 5.000000e-01 : f32
    %46 = vector.broadcast %cst_25 : f32 to vector<32x256xf32>
    %47 = arith.mulf %46, %45 : vector<32x256xf32>
    %48 = arith.mulf %35, %47 : vector<32x256xf32>
    %c0_26 = arith.constant 0 : index
    %c256_27 = arith.constant 256 : index
    %49 = vector.load %arg8[%c0_26, %c256_27] : memref<32x1024xf32, #tpu.memory_space<vmem>>, vector<32x256xf32>
    tpu.vector_store %arg8[%c0_26, %c256_27], %48 {strides = array<i32>} : memref<32x1024xf32, #tpu.memory_space<vmem>>, vector<32x256xf32>,
    %c0_28 = arith.constant 0 : index
    %c512 = arith.constant 512 : index
    %50 = vector.load %arg8[%c0_28, %c512] : memref<32x1024xf32, #tpu.memory_space<vmem>>, vector<32x256xf32>
    %51 = vector.extract_strided_slice %13 {offsets = [0, 2], sizes = [32, 1], strides = [1, 1]} : vector<32x4xf32> to vector<32x1xf32>
    %52 = vector.broadcast %51 : vector<32x1xf32> to vector<32x256xf32>
    %53 = arith.addf %50, %52 : vector<32x256xf32>
    %54 = arith.mulf %53, %53 : vector<32x256xf32>
    %55 = arith.mulf %53, %54 : vector<32x256xf32>
    %cst_29 = arith.constant 4.471500e-02 : f32
    %56 = vector.broadcast %cst_29 : f32 to vector<32x256xf32>
    %57 = arith.mulf %56, %55 : vector<32x256xf32>
    %58 = arith.addf %53, %57 : vector<32x256xf32>
    %cst_30 = arith.constant 0.797884583 : f32
    %59 = vector.broadcast %cst_30 : f32 to vector<32x256xf32>
    %60 = arith.mulf %59, %58 : vector<32x256xf32>
    %61 = math.tanh %60 : vector<32x256xf32>
    %cst_31 = arith.constant 1.000000e+00 : f32
    %62 = vector.broadcast %cst_31 : f32 to vector<32x256xf32>
    %63 = arith.addf %62, %61 : vector<32x256xf32>
    %cst_32 = arith.constant 5.000000e-01 : f32
    %64 = vector.broadcast %cst_32 : f32 to vector<32x256xf32>
    %65 = arith.mulf %64, %63 : vector<32x256xf32>
    %66 = arith.mulf %53, %65 : vector<32x256xf32>
    %c0_33 = arith.constant 0 : index
    %c512_34 = arith.constant 512 : index
    %67 = vector.load %arg8[%c0_33, %c512_34] : memref<32x1024xf32, #tpu.memory_space<vmem>>, vector<32x256xf32>
    tpu.vector_store %arg8[%c0_33, %c512_34], %66 {strides = array<i32>} : memref<32x1024xf32, #tpu.memory_space<vmem>>, vector<32x256xf32>,
    %c0_35 = arith.constant 0 : index
    %c768 = arith.constant 768 : index
    %68 = vector.load %arg8[%c0_35, %c768] : memref<32x1024xf32, #tpu.memory_space<vmem>>, vector<32x256xf32>
    %69 = vector.extract_strided_slice %13 {offsets = [0, 3], sizes = [32, 1], strides = [1, 1]} : vector<32x4xf32> to vector<32x1xf32>
    %70 = vector.broadcast %69 : vector<32x1xf32> to vector<32x256xf32>
    %71 = arith.addf %68, %70 : vector<32x256xf32>
    %72 = arith.mulf %71, %71 : vector<32x256xf32>
    %73 = arith.mulf %71, %72 : vector<32x256xf32>
    %cst_36 = arith.constant 4.471500e-02 : f32
    %74 = vector.broadcast %cst_36 : f32 to vector<32x256xf32>
    %75 = arith.mulf %74, %73 : vector<32x256xf32>
    %76 = arith.addf %71, %75 : vector<32x256xf32>
    %cst_37 = arith.constant 0.797884583 : f32
    %77 = vector.broadcast %cst_37 : f32 to vector<32x256xf32>
    %78 = arith.mulf %77, %76 : vector<32x256xf32>
    %79 = math.tanh %78 : vector<32x256xf32>
    %cst_38 = arith.constant 1.000000e+00 : f32
    %80 = vector.broadcast %cst_38 : f32 to vector<32x256xf32>
    %81 = arith.addf %80, %79 : vector<32x256xf32>
    %cst_39 = arith.constant 5.000000e-01 : f32
    %82 = vector.broadcast %cst_39 : f32 to vector<32x256xf32>
    %83 = arith.mulf %82, %81 : vector<32x256xf32>
    %84 = arith.mulf %71, %83 : vector<32x256xf32>
    %c0_40 = arith.constant 0 : index
    %c768_41 = arith.constant 768 : index
    %85 = vector.load %arg8[%c0_40, %c768_41] : memref<32x1024xf32, #tpu.memory_space<vmem>>, vector<32x256xf32>
    tpu.vector_store %arg8[%c0_40, %c768_41], %84 {strides = array<i32>} : memref<32x1024xf32, #tpu.memory_space<vmem>>, vector<32x256xf32>,
    %c0_42 = arith.constant 0 : index
    %c0_43 = arith.constant 0 : index
    %86 = vector.load %arg6[%c0_42, %c0_43] : memref<4x32xf32, #tpu.memory_space<vmem>>, vector<4x32xf32>
    %c0_44 = arith.constant 0 : index
    %c0_45 = arith.constant 0 : index
    %87 = vector.load %arg8[%c0_44, %c0_45] : memref<32x1024xf32, #tpu.memory_space<vmem>>, vector<32x1024xf32>
    %cst_46 = arith.constant dense<0.000000e+00> : vector<4x1024xf32>
    %88 = tpu.matmul %86, %87, %cst_46 {dimension_numbers = #tpu.dot_dimension_numbers<[1], [0], [0], [1], [0, 0, 1, 1], [], []>} : vector<4x32xf32>, vector<32x1024xf32>, vector<4x1024xf32> -> vector<4x1024xf32>
    %cst_47 = arith.constant 0.000000e+00 : f32
    %89 = vector.broadcast %cst_47 : f32 to vector<4x128xf32>
    %90 = vector.extract_strided_slice %1 {offsets = [0, 0], sizes = [4, 128], strides = [1, 1]} : vector<4x1024xf32> to vector<4x128xf32>
    %91 = vector.extract_strided_slice %88 {offsets = [0, 0], sizes = [4, 128], strides = [1, 1]} : vector<4x1024xf32> to vector<4x128xf32>
    %92 = arith.subf %90, %91 : vector<4x128xf32>
    %93 = arith.mulf %92, %92 : vector<4x128xf32>
    %94 = arith.addf %89, %93 : vector<4x128xf32>
    %95 = vector.extract_strided_slice %1 {offsets = [0, 128], sizes = [4, 128], strides = [1, 1]} : vector<4x1024xf32> to vector<4x128xf32>
    %96 = vector.extract_strided_slice %88 {offsets = [0, 128], sizes = [4, 128], strides = [1, 1]} : vector<4x1024xf32> to vector<4x128xf32>
    %97 = arith.subf %95, %96 : vector<4x128xf32>
    %98 = arith.mulf %97, %97 : vector<4x128xf32>
    %99 = arith.addf %94, %98 : vector<4x128xf32>
    %100 = vector.extract_strided_slice %1 {offsets = [0, 256], sizes = [4, 128], strides = [1, 1]} : vector<4x1024xf32> to vector<4x128xf32>
    %101 = vector.extract_strided_slice %88 {offsets = [0, 256], sizes = [4, 128], strides = [1, 1]} : vector<4x1024xf32> to vector<4x128xf32>
    %102 = arith.subf %100, %101 : vector<4x128xf32>
    %103 = arith.mulf %102, %102 : vector<4x128xf32>
    %104 = arith.addf %99, %103 : vector<4x128xf32>
    %105 = vector.extract_strided_slice %1 {offsets = [0, 384], sizes = [4, 128], strides = [1, 1]} : vector<4x1024xf32> to vector<4x128xf32>
    %106 = vector.extract_strided_slice %88 {offsets = [0, 384], sizes = [4, 128], strides = [1, 1]} : vector<4x1024xf32> to vector<4x128xf32>
    %107 = arith.subf %105, %106 : vector<4x128xf32>
    %108 = arith.mulf %107, %107 : vector<4x128xf32>
    %109 = arith.addf %104, %108 : vector<4x128xf32>
    %110 = vector.extract_strided_slice %1 {offsets = [0, 512], sizes = [4, 128], strides = [1, 1]} : vector<4x1024xf32> to vector<4x128xf32>
    %111 = vector.extract_strided_slice %88 {offsets = [0, 512], sizes = [4, 128], strides = [1, 1]} : vector<4x1024xf32> to vector<4x128xf32>
    %112 = arith.subf %110, %111 : vector<4x128xf32>
    %113 = arith.mulf %112, %112 : vector<4x128xf32>
    %114 = arith.addf %109, %113 : vector<4x128xf32>
    %115 = vector.extract_strided_slice %1 {offsets = [0, 640], sizes = [4, 128], strides = [1, 1]} : vector<4x1024xf32> to vector<4x128xf32>
    %116 = vector.extract_strided_slice %88 {offsets = [0, 640], sizes = [4, 128], strides = [1, 1]} : vector<4x1024xf32> to vector<4x128xf32>
    %117 = arith.subf %115, %116 : vector<4x128xf32>
    %118 = arith.mulf %117, %117 : vector<4x128xf32>
    %119 = arith.addf %114, %118 : vector<4x128xf32>
    %120 = vector.extract_strided_slice %1 {offsets = [0, 768], sizes = [4, 128], strides = [1, 1]} : vector<4x1024xf32> to vector<4x128xf32>
    %121 = vector.extract_strided_slice %88 {offsets = [0, 768], sizes = [4, 128], strides = [1, 1]} : vector<4x1024xf32> to vector<4x128xf32>
    %122 = arith.subf %120, %121 : vector<4x128xf32>
    %123 = arith.mulf %122, %122 : vector<4x128xf32>
    %124 = arith.addf %119, %123 : vector<4x128xf32>
    %125 = vector.extract_strided_slice %1 {offsets = [0, 896], sizes = [4, 128], strides = [1, 1]} : vector<4x1024xf32> to vector<4x128xf32>
    %126 = vector.extract_strided_slice %88 {offsets = [0, 896], sizes = [4, 128], strides = [1, 1]} : vector<4x1024xf32> to vector<4x128xf32>
    %127 = arith.subf %125, %126 : vector<4x128xf32>
    %128 = arith.mulf %127, %127 : vector<4x128xf32>
    %129 = arith.addf %124, %128 : vector<4x128xf32>
    %130 = vector.shape_cast %129 : vector<4x128xf32> to vector<1x4x128xf32>
    %c0_48 = arith.constant 0 : index
    %c0_49 = arith.constant 0 : index
    %c0_50 = arith.constant 0 : index
    %131 = vector.load %arg7[%c0_48, %c0_49, %c0_50] : memref<1x4x128xf32, #tpu.memory_space<vmem>>, vector<1x4x128xf32>
    tpu.vector_store %arg7[%c0_48, %c0_49, %c0_50], %130 {strides = array<i32>} : memref<1x4x128xf32, #tpu.memory_space<vmem>>, vector<1x4x128xf32>,
    return
  }
  func.func @transform_0(%arg0: i32) -> (i32, i32) {
    %c0_i32 = arith.constant 0 : i32
    %c0_i32_0 = arith.constant 0 : i32
    return %c0_i32, %arg0 : i32, i32
  }
  func.func @transform_1(%arg0: i32) -> (i32, i32) {
    %c0_i32 = arith.constant 0 : i32
    %c0_i32_0 = arith.constant 0 : i32
    return %c0_i32, %arg0 : i32, i32
  }
  func.func @transform_2(%arg0: i32) -> (i32, i32) {
    %c0_i32 = arith.constant 0 : i32
    %c0_i32_0 = arith.constant 0 : i32
    return %c0_i32, %arg0 : i32, i32
  }
  func.func @transform_3(%arg0: i32) -> (i32, i32, i32) {
    %c0_i32 = arith.constant 0 : i32
    %c0_i32_0 = arith.constant 0 : i32
    %c0_i32_1 = arith.constant 0 : i32
    return %arg0, %c0_i32, %c0_i32_0 : i32, i32, i32
  }
  func.func @transform_4(%arg0: i32) -> (i32, i32) {
    %c0_i32 = arith.constant 0 : i32
    %c0_i32_0 = arith.constant 0 : i32
    %c0_i32_1 = arith.constant 0 : i32
    return %c0_i32, %c0_i32_0 : i32, i32
  }
  func.func @transform_5(%arg0: i32) -> (i32, i32) {
    %c0_i32 = arith.constant 0 : i32
    %c0_i32_0 = arith.constant 0 : i32
    %c0_i32_1 = arith.constant 0 : i32
    return %c0_i32, %c0_i32_0 : i32, i32
  }
  func.func @transform_6(%arg0: i32) -> (i32, i32, i32) {
    %c0_i32 = arith.constant 0 : i32
    %c0_i32_0 = arith.constant 0 : i32
    %c0_i32_1 = arith.constant 0 : i32
    return %arg0, %c0_i32, %c0_i32_0 : i32, i32, i32
  }
}

</mosaic_0001>

<bundles_post_ra>
// kernel: tpu_custom_call.1
= control target key start
LH: loop header
LB: loop body
LE: loop exit
PB: predicated region body
PF: predicated region fallthrough
CT: control target
= control target key end

     0   :  { %s2507_s0 = inlined_call_operand.vmem [shape: f32[4,2048], index: 0, kind: input, shape index: {}]   ;;  %s2508_s1 = inlined_call_operand.hbm [shape: f32[4,2048], index: 1, kind: input, shape index: {}]   ;;  %s2509_s2 = inlined_call_operand.vmem [shape: f32[2,2048], index: 2, kind: input, shape index: {}]   ;;  %s2510_s3 = inlined_call_operand.vmem [shape: f32[2,32,4], index: 3, kind: input, shape index: {}]   ;;  %s2511_s4 = inlined_call_operand.vmem [shape: f32[32,4], index: 4, kind: input, shape index: {}]   ;;  %s2512_s5 = inlined_call_operand.vmem [shape: f32[4,32], index: 5, kind: input, shape index: {}]   ;;  %s2513_s6 = inlined_call_operand.hbm [shape: f32[2,4,128], index: 6, kind: output, shape index: {}]  }
   0x1   :  { %2514 = sst [smem:[#allocation9_spill]] %s2508_s1 }
   0x2   :  { %11 = vsyncpa [#allocation4], 0 }
   0x3   :  { %13 = vsyncpa [#allocation4 + $0x1], 0 }
   0x4   :  { %14 = vsyncpa [#allocation5], 0 }
   0x5   :  { %16 = vsyncpa [#allocation5 + $0x1], 0  ;;  %s1907_s21 = smov 0   ;;  %s1909_s22 = smov 0  }
   0x6   :  { %s1911_s23 = smov 0   ;;  %s1913_s24 = smov 0  }
   0x7 LB: > { %s1928_s25 = sadd.s32 4294967295, %s1866_s24   ;;  %s1572_s26 = sadd.s32 4294967294, %s1866_s24   ;;  %s1866_s24 = sphi %s1913_s24, %s2525_s24   ;;  %s1862_s23 = sphi %s1911_s23, %s2524_s23   ;;  %s1858_s22 = sphi %s1909_s22, %s2523_s22   ;;  %s1854_s21 = sphi %s1907_s21, %s2522_s21  }
   0x8   : > { %s1932_s27 = sadd.s32 1, %s1866_s24   ;;  %s55_s28 = sadd.s32 1, %s1862_s23 }
   0x9   : > { %s52_s29 = ssub.s32 %s1866_s24, %s1932_s27  ;;  %p62_p0 = scmp.ne.s32.totalorder %s1862_s23, %s1858_s22 }
   0xa   : > { %p53_p1 = scmp.eq.s32.totalorder %s52_s29, 0  ;;  %p63_p2 = scmp.eq.s32.totalorder %s1866_s24, 0 }
   0xb   : > { %p68_p3 = scmp.ne.s32.totalorder %s1858_s22, %s1854_s21  ;;  %p69_p4 = scmp.eq.s32.totalorder %s1928_s25, 0 }
   0xc   : > { %s1944_s30 = scalar_select %p53_p1, %s1862_s23, %s55_s28  }
   0xd   : > { %p1946_p5 = por %p63_p2, %p62_p0  ;;  %p1950_p6 = por %p69_p4, %p68_p3 }
   0xe   : > { %p186_p7 = scmp.eq.s32.totalorder %s1928_s25, 1  ;;  %p192_p8 = scmp.eq.s32.totalorder %s1572_s26, 1 }
   0xf   : > { %p1654_p10 = scmp.lt.s32.totalorder %s1866_s24, 2  ;;  %s227_s11 = sand.u32 1, %s1862_s23  }
  0x10   : > { %p1957_p11 = por %p186_p7, %p62_p0  ;;  %p1961_p12 = por %p192_p8, %p68_p3 }
  0x11   : > { %s1640_s12 = sshll.u32 %s1866_s24, 5  ;;  %s1575_s13 = sshll.u32 %s227_s11, 5 }
  0x12   : > { %s2519_s1 = sld [smem:[#allocation9_spill]]  ;;  %s231_s18 = scalar_lea.vmem [#allocation3], %s1575_s13 }
  0x13   : > { %s240_s19 = sshll.u32 %s231_s18, 4  ;;  %p1972_p13 = pnand %p1654_p10, %p1946_p5  ;;  %s241_s19 = int_to_ptr.vmem [resolvable:$true] %s240_s19 }
  0x14   : > { %p1578_p0 = scmp.ge.s32.totalorder %s1866_s24, 1  ;;  %p262_p1 = scmp.lt.s32.totalorder %s1866_s24, 3 }
  0x15   : > { %s228_s26 = scalar_lea.sflag [#allocation4], %s227_s11  ;;  %p1774_p3 = pneg %p1972_p13 }
  0x18   : > { %s236_s16 = scalar_lea.hbm %s2519_s1, %s1640_s12  ;;  %s1777_s7 = scalar_lea.hbm %s2519_s1, 64 }
  0x19   : > { %s238_s17 = sshll.u32 %s236_s16, 4  ;;  %s239_s17 = int_to_ptr.hbm [resolvable:$true] %s238_s17 }
  0x1a   : > { %s1770_s28 = sshra.s32 %s239_s17, 4  ;;  %s1771_s28 = int_to_ptr.hbm [resolvable:$true] %s1770_s28 }
  0x1b   : > { %s1772_s29 = scalar_lea.hbm %s1771_s28, 32  ;;  %p1778_p5 = scmp.lt.s32.totalorder %s1771_s28, %s2519_s1 }
  0x1c   : > { %p1773_p2 = scmp.ne.s32.totalorder %s1771_s28, %s1772_s29  ;;  %p1779_p8 = scmp.lt.s32.totalorder %s1777_s7, %s1772_s29 }
  0x1e   : > { %p1775_p4 = pnand %p1774_p3, %p1773_p2  ;;  %p1780_p10 = por %p1779_p8, %p1778_p5 }
  0x20   : > { %p1776_p7 = pneg %p1775_p4 }
  0x22   : > { %p1781_p9 = pnand %p1780_p10, %p1776_p7 }
  0x24   : > { %1784 = shalt.err (!%p1781_p9)
}
  0x25   : > { %1649 = dma.hbm_to_vmem [thread:$0]  (!%p1972_p13), %s239_s17, 512, %s241_s19, %s228_s26  }
  0x26   : > { %p263_p2 = pnand %p1578_p0, %p262_p1 }
  0x27   : > { %s1993_s11 = sand.u32 (!%p263_p2), 1, %s1858_s22  }
  0x28   : > { %266 = sbr.rel (%p263_p2) target bundleno = 439 (0x1b7), region = 44  ;;  %s1579_s16 = sshll.u32 (!%p263_p2), %s1993_s11, 5 }
  0x29   : > { %s269_s18 = scalar_lea.sflag (!%p263_p2), [#allocation4], %s1993_s11  ;;  %s1997_s28 = scalar_lea.vmem (!%p263_p2), [#allocation3], %s1579_s16 }
  0x2d   : > { %1845 = dma.done.wait (%p1950_p6), %s269_s18, 512  }
  0x2e   : > { %1847 = vsyncadd (%p1950_p6), %s269_s18, 4294966784  ;;  %p330_p9 = scmp.lt.s32.totalorder %s1928_s25, 1  ;;  %s1581_s17 = sshll.u32 %s1928_s25, 3  ;;  %v1868_v0 = vmov 1   ;;  %v2029_v8 = vld [vmem:[%s1997_s28] sm:$0xff]  ;;  %v2036_v13 = vld [vmem:[%s1997_s28 + $0x8] sm:$0xff] }
  0x2f   : > { %1694 = vset.pattern.permute.xlu1 %v1868_v0  ;;  %p318_p13 = scmp.lt.s32.totalorder %s1581_s17, 15  ;;  %1696 = vset.pattern.permute.xlu2 %v1868_v0  ;;  %v2043_v19 = vld [vmem:[%s1997_s28 + $0x18] sm:$0xff]  ;;  %v1869_v20 = vmov 0   ;;  %vm475_vm0 = vcmask 1043456   ;;  %vm462_vm1 = vcmask 31744   ;;  %v2058_v28 = vld [vmem:[%s1997_s28 + $0x10] sm:$0xff] }
  0x30   : > { %s331_s19 = scalar_select %p330_p9, %s1928_s25, 1  ;;  %1692 = vset.pattern.permute.xlu0 %v1868_v0  ;;  %v2076_v55 = vld [vmem:[%s2511_s4] sm:$0xff]  ;;  %vm1253_vm2 = vcmask 261120  }
  0x31   : > { %s2527_s17 = smov (!%p318_p13, %s1581_s17), 15  ;;  %s1580_s7 = sshll.u32 %s1993_s11, 2 }
  0x32   : > { %s1641_s20 = sshll.u32 %s331_s19, 5  ;;  %s1582_s12 = sshll.u32 %s2527_s17, 2 }
  0x33   : > { %s2012_s8 = scalar_lea.vmem %s2510_s3, %s1641_s20  ;;  %s321_s14 = scalar_lea.vmem %s2507_s0, %s1582_s12 }
  0x34   : > { %s1584_s15 = sshll.u32 %s2527_s17, 1  ;;  %v2018_v1 = vld [vmem:[%s2012_s8 + $0x10] sm:$0xff]  ;;  %v335_v2 = vld [vmem:[%s321_s14] sm:$0xff]  ;;  %v336_v3 = vld [vmem:[%s321_s14 + $0x8] sm:$0xff] }
  0x35   : > { %s328_s1 = scalar_lea.vmem %s2509_s2, %s1584_s15  ;;  %901 = vperm.xlu1 %1694, %v2018_v1   ;;  %365 = vst [vmem:[#allocation1] ss:$2 sm:$0xff] %v335_v2  ;;  %v338_v6 = vld [vmem:[%s321_s14 + $0x18] sm:$0xff]  ;;  %v337_v7 = vld [vmem:[%s321_s14 + $0x10] sm:$0xff]  ;;  %v2046_v21 = vld [vmem:[%s2012_s8 + $0x8] sm:$0xff]  ;;  %s1637_s14 = sshll.u32 %s1928_s25, 2 }
  0x36   : > { %v2024_v4 = vld [vmem:[%s328_s1] ss:$2 sm:$0xff]  ;;  %v2026_v5 = vld [vmem:[%s328_s1 + $0x1] ss:$2 sm:$0xff]  ;;  %367 = vst [vmem:[#allocation1 + $0x10] ss:$2 sm:$0xff] %v336_v3  ;;  %897 = vperm.xlu2 %1696, %v2046_v21   ;;  %s1461_s18 = scalar_lea.hbm %s2513_s6, %s1637_s14 }
  0x37   : > { %371 = vst [vmem:[#allocation1 + $0x30] ss:$2 sm:$0xff] %v338_v6  ;;  %v345_v9 = vperm.slane %v2024_v4, 0  ;;  %v399_v10 = vperm.slane %v2026_v5, 0  ;;  %v346_v11 = vperm.slane %v2024_v4, 1  ;;  %v400_v12 = vperm.slane %v2026_v5, 1 }
  0x38   : > { %369 = vst [vmem:[#allocation1 + $0x20] ss:$2 sm:$0xff] %v337_v7  ;;  %v347_v14 = vperm.slane %v2024_v4, 2  ;;  %v401_v15 = vperm.slane %v2026_v5, 2  ;;  %v348_v18 = vperm.slane %v2024_v4, 3  ;;  %v2049_v22 = vld [vmem:[%s2012_s8 + $0x18] sm:$0xff] }
  0x39   : > { %v402_v25 = vperm.slane %v2026_v5, 3  ;;  %v351_v26 = vperm.slane %v2024_v4, 6  ;;  %v405_v27 = vperm.slane %v2026_v5, 6  ;;  %905 = vperm.xlu0 %1692, %v2049_v22   ;;  %v352_v31 = vperm.slane %v2024_v4, 7  ;;  %v2070_v41 = vld [vmem:[%s2012_s8] sm:$0xff]  ;;  %s316_s1 = scalar_lea.vmem [#allocation6], %s1580_s7 }
  0x3a   : > { %v406_v33 = vperm.slane %v2026_v5, 7  ;;  %v349_v34 = vperm.slane %v2024_v4, 4  ;;  %v403_v36 = vperm.slane %v2026_v5, 4  ;;  %v350_v39 = vperm.slane %v2024_v4, 5  ;;  %s1463_s28 = sshll.u32 %s316_s1, 4  ;;  %s1465_s17 = sshll.u32 %s1461_s18, 4  ;;  %s1464_s28 = int_to_ptr.vmem [resolvable:$true] %s1463_s28  ;;  %s1466_s17 = int_to_ptr.hbm [resolvable:$true] %s1465_s17 }
  0x3b   : > { %v404_v40 = vperm.slane %v2026_v5, 5  ;;  %s1451_s25 = scalar_lea.sflag [#allocation5], %s1993_s11  ;;  %s1814_s19 = sshra.s32 %s1466_s17, 4  ;;  %s1815_s19 = int_to_ptr.hbm [resolvable:$true] %s1814_s19 }
  0x3c   : > { %v372_v16 = vld.sshfl [vmem:[#allocation1] sm:$0xff pattern:$0x75316420]  ;;  %v373_v17 = vld.sshfl [vmem:[#allocation1 + $0x8] sm:$0xff pattern:$0x75316420]  ;;  %p1821_p3 = scmp.lt.s32.totalorder %s1815_s19, %s2513_s6 }
  0x3d   : > { %419 = vst [vmem:[#allocation1] ss:$2 sm:$0xff] %v2029_v8  ;;  %1695 = vset.pattern.permute.xlu1 %v1869_v20  ;;  %v374_v23 = vld.sshfl [vmem:[#allocation1 + $0x10] sm:$0xff pattern:$0x75316420]  ;;  %v388_v37 = vmul.f32 %v372_v16, %v345_v9  ;;  %v389_v38 = vmul.f32 %v373_v17, %v346_v11  ;;  %v459_v11 = vld [vmem:[%s2511_s4 + $0x8] sm:$0xff] }
  0x3e   : > { %v375_v24 = vld.sshfl [vmem:[#allocation1 + $0x18] sm:$0xff pattern:$0x75316420]  ;;  %788 = vperm.xlu1 %1695, %v2018_v1   ;;  %v378_v29 = vld.sshfl [vmem:[#allocation1 + $0x30] sm:$0xff pattern:$0x75316420]  ;;  %v390_v46 = vmul.f32 %v374_v23, %v347_v14  ;;  %1697 = vset.pattern.permute.xlu2 %v1869_v20 }
  0x3f   : > { %421 = vst [vmem:[#allocation1 + $0x10] ss:$2 sm:$0xff] %v2036_v13  ;;  %v379_v30 = vld.sshfl [vmem:[#allocation1 + $0x38] sm:$0xff pattern:$0x75316420]  ;;  %v391_v47 = vmul.f32 %v375_v24, %v348_v18  ;;  %v394_v50 = vmul.f32 %v378_v29, %v351_v26  ;;  %783 = vperm.xlu2 %1697, %v2046_v21   ;;  %v1871_v14 = vmov 3  }
  0x40   : > { %425 = vst [vmem:[#allocation1 + $0x30] ss:$2 sm:$0xff] %v2043_v19  ;;  %v376_v32 = vld.sshfl [vmem:[#allocation1 + $0x20] sm:$0xff pattern:$0x75316420]  ;;  %v395_v57 = vmul.f32 %v379_v30, %v352_v31  ;;  %v461_v16 = vld [vmem:[%s2511_s4 + $0x18] sm:$0xff] }
  0x41   : > { %v377_v35 = vld.sshfl [vmem:[#allocation1 + $0x28] sm:$0xff pattern:$0x75316420]  ;;  %v392_v59 = vmul.f32 %v376_v32, %v349_v34  ;;  %1693 = vset.pattern.permute.xlu0 %v1869_v20  ;;  %s1816_s20 = scalar_lea.hbm %s1815_s19, 4  ;;  %s1820_s8 = scalar_lea.hbm %s2513_s6, 8 }
  0x42   : > { %423 = vst [vmem:[#allocation1 + $0x20] ss:$2 sm:$0xff] %v2058_v28  ;;  %v393_v60 = vmul.f32 %v377_v35, %v350_v39  ;;  %793 = vperm.xlu0 %1693, %v2049_v22   ;;  %p1817_p6 = scmp.ne.s32.totalorder %s1815_s19, %s1816_s20  ;;  %p1822_p4 = scmp.lt.s32.totalorder %s1820_s8, %s1816_s20 }
  0x44   : > { %v426_v42 = vld.sshfl [vmem:[#allocation1] sm:$0xff pattern:$0x75316420]  ;;  %v427_v43 = vld.sshfl [vmem:[#allocation1 + $0x8] sm:$0xff pattern:$0x75316420]  ;;  %p1818_p0 = pnand %p1817_p6, %p1957_p11  ;;  %p1823_p7 = por %p1822_p4, %p1821_p3 }
  0x45   : > { %v442_v44 = vmul.f32 %v426_v42, %v399_v10  ;;  %v443_v45 = vmul.f32 %v427_v43, %v400_v12  ;;  %v1870_v12 = vmov 2  }
  0x46   : > { %v428_v48 = vld.sshfl [vmem:[#allocation1 + $0x10] sm:$0xff pattern:$0x75316420]  ;;  %v429_v49 = vld.sshfl [vmem:[#allocation1 + $0x18] sm:$0xff pattern:$0x75316420]  ;;  %1698 = vset.pattern.permute.xlu1 %v1868_v0  ;;  %p1819_p1 = pneg %p1818_p0 }
  0x47   : > { %v450_v51 = vadd.f32 %v442_v44, %v388_v37  ;;  %v451_v52 = vadd.f32 %v443_v45, %v389_v38  ;;  %v444_v53 = vmul.f32 %v428_v48, %v401_v15  ;;  %v445_v54 = vmul.f32 %v429_v49, %v402_v25  ;;  %893 = vperm.xlu1 %1698, %v2070_v41   ;;  %v432_v56 = vld.sshfl [vmem:[#allocation1 + $0x30] sm:$0xff pattern:$0x75316420]  ;;  %v433_v58 = vld.sshfl [vmem:[#allocation1 + $0x38] sm:$0xff pattern:$0x75316420] }
  0x48   : > { %v448_v63 = vmul.f32 %v432_v56, %v405_v27  ;;  %v449_v0 = vmul.f32 %v433_v58, %v406_v33  ;;  %778 = vperm.xlu2 %1697, %v2070_v41   ;;  %v460_v15 = vld [vmem:[%s2511_s4 + $0x10] sm:$0xff]  ;;  %p1824_p5 = pnand %p1823_p7, %p1819_p1 }
  0x49   : > { %1588 = vmatpush.msk.msra.mxu0 %vm475_vm0, %v450_v51  ;;  %1593 = vmatpush.msk.msra.mxu1 %vm475_vm0, %v451_v52  ;;  %v452_v61 = vadd.f32 %v444_v53, %v390_v46  ;;  %v453_v62 = vadd.f32 %v445_v54, %v391_v47  ;;  %v430_v2 = vld.sshfl [vmem:[#allocation1 + $0x20] sm:$0xff pattern:$0x75316420]  ;;  %v431_v3 = vld.sshfl [vmem:[#allocation1 + $0x28] sm:$0xff pattern:$0x75316420] }
  0x4a   : > { %1589 = vmatmul.msk.f32.vlgmr.msra.gmra.mxu0 %vm462_vm1, %v2076_v55  ;;  %1594 = vmatmul.msk.f32.vlgmr.msra.gmra.mxu1 %vm462_vm1, %v2076_v55  ;;  %v456_v4 = vadd.f32 %v448_v63, %v394_v50  ;;  %v446_v5 = vmul.f32 %v430_v2, %v403_v36  ;;  %v447_v6 = vmul.f32 %v431_v3, %v404_v40 }
  0x4b   : > { %1598 = vmatpush.msk.msra.mxu2 %vm475_vm0, %v452_v61  ;;  %1603 = vmatpush.msk.msra.mxu3 %vm475_vm0, %v453_v62  ;;  %v457_v7 = vadd.f32 %v449_v0, %v395_v57 }
  0x4c   : > { %1599 = vmatmul.msk.f32.vlgmr.msra.gmra.mxu2 %vm462_vm1, %v2076_v55  ;;  %1604 = vmatmul.msk.f32.vlgmr.msra.gmra.mxu3 %vm462_vm1, %v2076_v55  ;;  %v454_v9 = vadd.f32 %v446_v5, %v392_v59  ;;  %v455_v10 = vadd.f32 %v447_v6, %v393_v60 }
  0x4d   : > { %1618 = vmatpush.msk.msrb.mxu2 %vm475_vm0, %v456_v4  ;;  %1623 = vmatpush.msk.msrb.mxu3 %vm475_vm0, %v457_v7 }
  0x4e   : > { %1608 = vmatpush.msk.msrb.mxu0 %vm475_vm0, %v454_v9  ;;  %1613 = vmatpush.msk.msrb.mxu1 %vm475_vm0, %v455_v10 }
  0x4f   : > { %1700 = vset.pattern.permute.xlu1 %v1870_v12  ;;  %1699 = vset.pattern.permute.xlu0 %v1871_v14 }
  0x50   : > { %1017 = vperm.xlu1 %1700, %v2049_v22   ;;  %1129 = vperm.xlu0 %1699, %v2049_v22  }
  0x51   : > { %1701 = vset.pattern.permute.xlu2 %v1871_v14 }
  0x52   : > { %1590 = vmatmul.msk.f32.gmra.mxu0 %vm462_vm1, %v459_v11  ;;  %1595 = vmatmul.msk.f32.gmra.mxu1 %vm462_vm1, %v459_v11 }
  0x53   : > { %1125 = vperm.xlu2 %1701, %v2018_v1  }
  0x54   : > { %1600 = vmatmul.msk.f32.gmra.mxu2 %vm462_vm1, %v459_v11  ;;  %1605 = vmatmul.msk.f32.gmra.mxu3 %vm462_vm1, %v459_v11 }
  0x58   : > { %1013 = vperm.xlu1 %1700, %v2018_v1   ;;  %1702 = vset.pattern.permute.xlu0 %v1870_v12 }
  0x59   : > { %1009 = vperm.xlu0 %1702, %v2046_v21  }
  0x5a   : > { %1591 = vmatmul.msk.f32.gmra.mxu0 %vm462_vm1, %v460_v15  ;;  %1596 = vmatmul.msk.f32.gmra.mxu1 %vm462_vm1, %v460_v15 }
  0x5b   : > { %1121 = vperm.xlu2 %1701, %v2046_v21  }
  0x5c   : > { %1601 = vmatmul.msk.f32.gmra.mxu2 %vm462_vm1, %v460_v15  ;;  %1606 = vmatmul.msk.f32.gmra.mxu3 %vm462_vm1, %v460_v15 }
  0x60   : > { %1703 = vset.pattern.permute.xlu1 %v1871_v14 }
  0x61   : > { %1117 = vperm.xlu1 %1703, %v2070_v41   ;;  %1705 = vset.pattern.permute.xlu0 %v1871_v14 }
  0x62   : > { %1592 = vmatmul.msk.f32.gmra.mxu0 %vm462_vm1, %v461_v16  ;;  %1597 = vmatmul.msk.f32.gmra.mxu1 %vm462_vm1, %v461_v16 }
  0x63   : > { %1704 = vset.pattern.permute.xlu2 %v1870_v12 }
  0x64   : > { %1602 = vmatmul.msk.f32.gmra.mxu2 %vm462_vm1, %v461_v16  ;;  %1607 = vmatmul.msk.f32.gmra.mxu3 %vm462_vm1, %v461_v16 }
  0x65   : > { %1005 = vperm.xlu2 %1704, %v2070_v41  }
  0x6a   : > { %1609 = vmatmul.msk.f32.vlgmr.msrb.gmra.mxu0 %vm462_vm1, %v2076_v55  ;;  %1614 = vmatmul.msk.f32.vlgmr.msrb.gmra.mxu1 %vm462_vm1, %v2076_v55 }
  0x6c   : > { %1619 = vmatmul.msk.f32.vlgmr.msrb.gmra.mxu2 %vm462_vm1, %v2076_v55  ;;  %1624 = vmatmul.msk.f32.vlgmr.msrb.gmra.mxu3 %vm462_vm1, %v2076_v55 }
  0x72   : > { %1610 = vmatmul.msk.f32.gmra.mxu0 %vm462_vm1, %v459_v11  ;;  %1615 = vmatmul.msk.f32.gmra.mxu1 %vm462_vm1, %v459_v11 }
  0x74   : > { %1620 = vmatmul.msk.f32.gmra.mxu2 %vm462_vm1, %v459_v11  ;;  %1625 = vmatmul.msk.f32.gmra.mxu3 %vm462_vm1, %v459_v11 }
  0x7a   : > { %1611 = vmatmul.msk.f32.gmra.mxu0 %vm462_vm1, %v460_v15  ;;  %1616 = vmatmul.msk.f32.gmra.mxu1 %vm462_vm1, %v460_v15 }
  0x7c   : > { %1621 = vmatmul.msk.f32.gmra.mxu2 %vm462_vm1, %v460_v15  ;;  %1626 = vmatmul.msk.f32.gmra.mxu3 %vm462_vm1, %v460_v15 }
  0x82   : > { %1612 = vmatmul.msk.f32.gmra.mxu0 %vm462_vm1, %v461_v16  ;;  %1617 = vmatmul.msk.f32.gmra.mxu1 %vm462_vm1, %v461_v16 }
  0x84   : > { %1622 = vmatmul.msk.f32.gmra.mxu2 %vm462_vm1, %v461_v16  ;;  %1627 = vmatmul.msk.f32.gmra.mxu3 %vm462_vm1, %v461_v16 }
  0x90   : > { %v898_v1 = vpop.permute.xlu2 %897 }
  0x99   : > { %v784_v18 = vpop.permute.xlu2 %783 }
  0xa2   : > { %v779_v21 = vpop.permute.xlu2 %778 }
  0xa7   : > { %v2147_v17 = vpop.permute.xlu1 %901 }
  0xab   : > { %v2159_v34 = vpop.permute.xlu0 %905 }
  0xad   : > { %v2175_v47 = vpop.permute.xlu2 %1125 }
  0xb0   : > { %v789_v20 = vpop.permute.xlu1 %788 }
  0xb4   : > { %v794_v15 = vpop.permute.xlu0 %793 }
  0xb9   : > { %v894_v31 = vpop.permute.xlu1 %893 }
  0xc2   : > { %v2195_v7 = vpop.permute.xlu1 %1017 }
  0xc7   : > { %v517_v22 = vpop.f32.mrf.mxu0  ;;  %v546_v23 = vpop.f32.mrf.mxu1 }
  0xc8   : > { %v2149_v24 = vadd.f32 %v779_v21, %v517_v22  ;;  %v2151_v25 = vadd.f32 %v779_v21, %v546_v23 }
  0xca   : > { %v804_v26 = vmul.f32 %v2149_v24, %v2149_v24  ;;  %v805_v27 = vmul.f32 %v2151_v25, %v2151_v25 }
  0xcc   : > { %v812_v29 = vmul.f32 %v804_v26, %v2149_v24  ;;  %v813_v30 = vmul.f32 %v805_v27, %v2151_v25  ;;  %v2209_v26 = vpop.permute.xlu2 %1121 }
  0xce   : > { %v820_v32 = vmul.f32 0.044715, %v812_v29  ;;  %v821_v33 = vmul.f32 0.044715, %v813_v30 }
  0xcf   : > { %v575_v35 = vpop.f32.mrf.mxu2  ;;  %v604_v36 = vpop.f32.mrf.mxu3 }
  0xd0   : > { %v828_v37 = vadd.f32 %v820_v32, %v2149_v24  ;;  %v829_v38 = vadd.f32 %v821_v33, %v2151_v25  ;;  %v2163_v39 = vadd.f32 %v894_v31, %v575_v35  ;;  %v2165_v40 = vadd.f32 %v894_v31, %v604_v36  ;;  %v520_v41 = vpop.f32.mrf.mxu0  ;;  %v549_v42 = vpop.f32.mrf.mxu1 }
  0xd1   : > { %v2167_v43 = vadd.f32 %v784_v18, %v520_v41  ;;  %v2169_v44 = vadd.f32 %v784_v18, %v549_v42 }
  0xd2   : > { %v916_v45 = vmul.f32 %v2163_v39, %v2163_v39  ;;  %v917_v46 = vmul.f32 %v2165_v40, %v2165_v40  ;;  %v836_v48 = vmul.f32 0.7978846, %v828_v37  ;;  %v837_v49 = vmul.f32 0.7978846, %v829_v38 }
  0xd3   : > { %v806_v50 = vmul.f32 %v2167_v43, %v2167_v43  ;;  %v807_v51 = vmul.f32 %v2169_v44, %v2169_v44 }
  0xd4   : > { %v924_v52 = vmul.f32 %v916_v45, %v2163_v39  ;;  %v925_v53 = vmul.f32 %v917_v46, %v2165_v40  ;;  %1706 = vtanh.f32 %v836_v48 }
  0xd5   : > { %v814_v54 = vmul.f32 %v806_v50, %v2167_v43  ;;  %v815_v55 = vmul.f32 %v807_v51, %v2169_v44  ;;  %1708 = vtanh.f32 %v837_v49 }
  0xd6   : > { %v932_v56 = vmul.f32 0.044715, %v924_v52  ;;  %v933_v57 = vmul.f32 0.044715, %v925_v53 }
  0xd7   : > { %v822_v58 = vmul.f32 0.044715, %v814_v54  ;;  %v823_v59 = vmul.f32 0.044715, %v815_v55  ;;  %v578_v60 = vpop.f32.mrf.mxu2  ;;  %v607_v61 = vpop.f32.mrf.mxu3 }
  0xd8   : > { %v2185_v62 = vadd.f32 %v898_v1, %v578_v60  ;;  %v2187_v63 = vadd.f32 %v898_v1, %v607_v61  ;;  %v523_v0 = vpop.f32.mrf.mxu0  ;;  %v552_v2 = vpop.f32.mrf.mxu1  ;;  %v940_v10 = vadd.f32 %v932_v56, %v2163_v39  ;;  %v941_v11 = vadd.f32 %v933_v57, %v2165_v40 }
  0xd9   : > { %v830_v3 = vadd.f32 %v822_v58, %v2167_v43  ;;  %v831_v4 = vadd.f32 %v823_v59, %v2169_v44  ;;  %v2191_v5 = vadd.f32 %v789_v20, %v523_v0  ;;  %v2193_v6 = vadd.f32 %v789_v20, %v552_v2  ;;  %v2236_v61 = vpop.permute.xlu1 %1013 }
  0xda   : > { %v1707_v9 = vpop.eup %1706  ;;  %v918_v12 = vmul.f32 %v2185_v62, %v2185_v62  ;;  %v919_v14 = vmul.f32 %v2187_v63, %v2187_v63  ;;  %v948_v33 = vmul.f32 0.7978846, %v940_v10  ;;  %v2213_v35 = vmul.f32 0.7978846, %v941_v11  ;;  %v2243_v11 = vpop.permute.xlu0 %1129 }
  0xdb   : > { %v1709_v16 = vpop.eup %1708  ;;  %v808_v1 = vmul.f32 %v2191_v5, %v2191_v5  ;;  %v809_v18 = vmul.f32 %v2193_v6, %v2193_v6  ;;  %v838_v20 = vmul.f32 0.7978846, %v830_v3  ;;  %v839_v21 = vmul.f32 0.7978846, %v831_v4 }
  0xdc   : > { %v926_v22 = vmul.f32 %v918_v12, %v2185_v62  ;;  %v927_v23 = vmul.f32 %v919_v14, %v2187_v63  ;;  %v852_v27 = vadd.f32 1.0, %v1707_v9  ;;  %v853_v29 = vadd.f32 1.0, %v1709_v16 }
  0xdd   : > { %v816_v30 = vmul.f32 %v808_v1, %v2191_v5  ;;  %v817_v31 = vmul.f32 %v809_v18, %v2193_v6  ;;  %1710 = vtanh.f32 %v838_v20  ;;  %v1006_v18 = vpop.permute.xlu2 %1005 }
  0xde   : > { %v934_v32 = vmul.f32 0.044715, %v926_v22  ;;  %1712 = vtanh.f32 %v839_v21  ;;  %v935_v36 = vmul.f32 0.044715, %v927_v23  ;;  %v860_v50 = vmul.f32 0.5, %v852_v27 }
  0xdf   : > { %v824_v37 = vmul.f32 0.044715, %v816_v30  ;;  %v825_v38 = vmul.f32 0.044715, %v817_v31  ;;  %v581_v41 = vpop.f32.mrf.mxu2  ;;  %v610_v42 = vpop.f32.mrf.mxu3  ;;  %v861_v51 = vmul.f32 0.5, %v853_v29  ;;  %1714 = vtanh.f32 %v948_v33 }
  0xe0   : > { %v2216_v45 = vadd.f32 %v2147_v17, %v581_v41  ;;  %v2219_v46 = vadd.f32 %v2147_v17, %v610_v42  ;;  %v526_v48 = vpop.f32.mrf.mxu0  ;;  %v555_v49 = vpop.f32.mrf.mxu1  ;;  %v942_v56 = vadd.f32 %v934_v32, %v2185_v62  ;;  %v2239_v4 = vadd.f32 %v935_v36, %v2187_v63 }
  0xe1   : > { %v832_v52 = vadd.f32 %v824_v37, %v2191_v5  ;;  %v833_v53 = vadd.f32 %v825_v38, %v2193_v6  ;;  %v2223_v54 = vadd.f32 %v794_v15, %v526_v48  ;;  %v2225_v55 = vadd.f32 %v794_v15, %v555_v49 }
  0xe2   : > { %v920_v57 = vmul.f32 %v2216_v45, %v2216_v45  ;;  %v921_v17 = vmul.f32 %v2219_v46, %v2219_v46  ;;  %v2248_v16 = vmul.f32 %v860_v50, %v2149_v24  ;;  %v950_v21 = vmul.f32 0.7978846, %v942_v56 }
  0xe3   : > { %v1711_v58 = vpop.eup %1710  ;;  %v810_v59 = vmul.f32 %v2223_v54, %v2223_v54  ;;  %v811_v60 = vmul.f32 %v2225_v55, %v2225_v55  ;;  %v840_v0 = vmul.f32 0.7978846, %v832_v52  ;;  %v841_v2 = vmul.f32 0.7978846, %v833_v53 }
  0xe4   : > { %v1713_v3 = vpop.eup %1712  ;;  %v928_v9 = vmul.f32 %v920_v57, %v2216_v45  ;;  %v929_v10 = vmul.f32 %v921_v17, %v2219_v46  ;;  %v854_v12 = vadd.f32 1.0, %v1711_v58  ;;  %v2251_v31 = vmul.f32 %v861_v51, %v2151_v25 }
  0xe5   : > { %v818_v14 = vmul.f32 %v810_v59, %v2223_v54  ;;  %v819_v15 = vmul.f32 %v811_v60, %v2225_v55  ;;  %1716 = vtanh.f32 %v840_v0  ;;  %v855_v20 = vadd.f32 1.0, %v1713_v3  ;;  %v2253_v32 = vpop.eup %1714 }
  0xe6   : > { %v936_v1 = vmul.f32 0.044715, %v928_v9  ;;  %1718 = vtanh.f32 %v841_v2  ;;  %v937_v22 = vmul.f32 0.044715, %v929_v10  ;;  %v862_v41 = vmul.f32 0.5, %v854_v12  ;;  %v1118_v10 = vpop.permute.xlu1 %1117 }
  0xe7   : > { %v826_v23 = vmul.f32 0.044715, %v818_v14  ;;  %v827_v27 = vmul.f32 0.044715, %v819_v15  ;;  %v584_v29 = vpop.f32.mrf.mxu2  ;;  %v613_v30 = vpop.f32.mrf.mxu3  ;;  %v863_v52 = vmul.f32 0.5, %v855_v20  ;;  %1720 = vtanh.f32 %v950_v21 }
  0xe8   : > { %v944_v33 = vadd.f32 %v936_v1, %v2216_v45  ;;  %v2257_v24 = vadd.f32 %v2159_v34, %v584_v29  ;;  %v2260_v36 = vadd.f32 %v2159_v34, %v613_v30  ;;  %v633_v37 = vpop.f32.mrf.mxu0  ;;  %v662_v38 = vpop.f32.mrf.mxu1  ;;  %v2277_v59 = vadd.f32 %v937_v22, %v2219_v46 }
  0xe9   : > { %v834_v42 = vadd.f32 %v826_v23, %v2223_v54  ;;  %v835_v48 = vadd.f32 %v827_v27, %v2225_v55  ;;  %v2264_v49 = vadd.f32 %v1006_v18, %v633_v37  ;;  %v2266_v25 = vadd.f32 %v1006_v18, %v662_v38  ;;  %v1010_v1 = vpop.permute.xlu0 %1009 }
  0xea   : > { %v922_v50 = vmul.f32 %v2257_v24, %v2257_v24  ;;  %v923_v51 = vmul.f32 %v2260_v36, %v2260_v36  ;;  %v952_v2 = vmul.f32 0.7978846, %v944_v33  ;;  %v2284_v18 = vmul.f32 %v862_v41, %v2167_v43 }
  0xeb   : > { %v1717_v34 = vpop.eup %1716  ;;  %v842_v53 = vmul.f32 0.7978846, %v834_v42  ;;  %v843_v56 = vmul.f32 0.7978846, %v835_v48  ;;  %v1028_v57 = vmul.f32 %v2264_v49, %v2264_v49  ;;  %v1029_v17 = vmul.f32 %v2266_v25, %v2266_v25 }
  0xec   : > { %v1719_v58 = vpop.eup %1718  ;;  %v930_v60 = vmul.f32 %v922_v50, %v2257_v24  ;;  %v931_v0 = vmul.f32 %v923_v51, %v2260_v36  ;;  %v856_v12 = vadd.f32 1.0, %v1717_v34  ;;  %v2287_v27 = vmul.f32 %v863_v52, %v2169_v44 }
  0xed   : > { %1722 = vtanh.f32 %v842_v53  ;;  %v1036_v3 = vmul.f32 %v1028_v57, %v2264_v49  ;;  %v1037_v9 = vmul.f32 %v1029_v17, %v2266_v25  ;;  %v857_v23 = vadd.f32 1.0, %v1719_v58  ;;  %v1721_v29 = vpop.eup %1720 }
  0xee   : > { %1724 = vtanh.f32 %v843_v56  ;;  %v938_v14 = vmul.f32 0.044715, %v930_v60  ;;  %v939_v15 = vmul.f32 0.044715, %v931_v0  ;;  %v864_v51 = vmul.f32 0.5, %v856_v12 }
  0xef   : > { %v1044_v20 = vmul.f32 0.044715, %v1036_v3  ;;  %v691_v21 = vpop.f32.mrf.mxu2  ;;  %v720_v22 = vpop.f32.mrf.mxu3  ;;  %1726 = vtanh.f32 %v952_v2  ;;  %v1045_v41 = vmul.f32 0.044715, %v1037_v9  ;;  %v865_v60 = vmul.f32 0.5, %v857_v23 }
  0xf0   : > { %v946_v30 = vadd.f32 %v938_v14, %v2257_v24  ;;  %v947_v33 = vadd.f32 %v939_v15, %v2260_v36  ;;  %v2291_v37 = vadd.f32 %v1118_v10, %v691_v21  ;;  %v2293_v38 = vadd.f32 %v1118_v10, %v720_v22  ;;  %v636_v42 = vpop.f32.mrf.mxu0  ;;  %v665_v43 = vpop.f32.mrf.mxu1 }
  0xf1   : > { %v2295_v48 = vadd.f32 %v1010_v1, %v636_v42  ;;  %v2297_v50 = vadd.f32 %v1010_v1, %v665_v43  ;;  %v2304_v57 = vadd.f32 %v1044_v20, %v2264_v49  ;;  %v2315_v1 = vadd.f32 %v1045_v41, %v2266_v25 }
  0xf2   : > { %v954_v44 = vmul.f32 0.7978846, %v946_v30  ;;  %v955_v52 = vmul.f32 0.7978846, %v947_v33  ;;  %v1140_v34 = vmul.f32 %v2291_v37, %v2291_v37  ;;  %v1141_v53 = vmul.f32 %v2293_v38, %v2293_v38 }
  0xf3   : > { %v1723_v56 = vpop.eup %1722  ;;  %v1030_v17 = vmul.f32 %v2295_v48, %v2295_v48  ;;  %v1031_v58 = vmul.f32 %v2297_v50, %v2297_v50  ;;  %v872_v22 = vmul.f32 %v864_v51, %v2191_v5  ;;  %v873_v43 = vmul.f32 %v865_v60, %v2193_v6 }
  0xf4   : > { %v1725_v0 = vpop.eup %1724  ;;  %1728 = vtanh.f32 %v954_v44  ;;  %v1148_v2 = vmul.f32 %v1140_v34, %v2291_v37  ;;  %v1149_v3 = vmul.f32 %v1141_v53, %v2293_v38  ;;  %v858_v9 = vadd.f32 1.0, %v1723_v56 }
  0xf5   : > { %v1727_v10 = vpop.eup %1726  ;;  %1730 = vtanh.f32 %v955_v52  ;;  %v1038_v12 = vmul.f32 %v1030_v17, %v2295_v48  ;;  %v1039_v14 = vmul.f32 %v1031_v58, %v2297_v50  ;;  %v859_v15 = vadd.f32 1.0, %v1725_v0 }
  0xf6   : > { %v1156_v20 = vmul.f32 0.044715, %v1148_v2  ;;  %v866_v21 = vmul.f32 0.5, %v858_v9  ;;  %v2318_v23 = vmul.f32 0.044715, %v1149_v3  ;;  %v968_v44 = vadd.f32 1.0, %v1727_v10 }
  0xf7   : > { %v694_v30 = vpop.f32.mrf.mxu2  ;;  %v723_v33 = vpop.f32.mrf.mxu3  ;;  %v867_v42 = vmul.f32 0.5, %v859_v15  ;;  %v1046_v52 = vmul.f32 0.044715, %v1038_v12  ;;  %v1047_v34 = vmul.f32 0.044715, %v1039_v14  ;;  %v966_v6 = vadd.f32 1.0, %v1721_v29 }
  0xf8   : > { %v2322_v53 = vadd.f32 %v2209_v26, %v694_v30  ;;  %v2325_v41 = vadd.f32 %v2209_v26, %v723_v33  ;;  %v639_v56 = vpop.f32.mrf.mxu0  ;;  %v668_v17 = vpop.f32.mrf.mxu1  ;;  %v2328_v5 = vadd.f32 %v1156_v20, %v2291_v37  ;;  %v874_v2 = vmul.f32 %v866_v21, %v2223_v54 }
  0xf9   : > { %v2331_v51 = vadd.f32 %v2236_v61, %v639_v56  ;;  %v2334_v58 = vadd.f32 %v2236_v61, %v668_v17  ;;  %v875_v3 = vmul.f32 %v867_v42, %v2225_v55  ;;  %v976_v29 = vmul.f32 0.5, %v968_v44 }
  0xfa   : > { %v1729_v60 = vpop.eup %1728  ;;  %v1142_v0 = vmul.f32 %v2322_v53, %v2322_v53  ;;  %v1143_v26 = vmul.f32 %v2325_v41, %v2325_v41  ;;  %1269 = vmatpush.msra.mxu0 %v874_v2  ;;  %v953_v54 = vmul.f32 0.7978846, %v2277_v59  ;;  %v2350_v55 = vadd.f32 %v1046_v52, %v2295_v48 }
  0xfb   : > { %v1731_v9 = vpop.eup %1730  ;;  %v1032_v10 = vmul.f32 %v2331_v51, %v2331_v51  ;;  %v1033_v61 = vmul.f32 %v2334_v58, %v2334_v58  ;;  %v970_v12 = vadd.f32 1.0, %v1729_v60  ;;  %1289 = vmatpush.msra.mxu1 %v875_v3  ;;  %v2355_v42 = vadd.f32 %v1047_v34, %v2297_v50 }
  0xfc   : > { %v1150_v14 = vmul.f32 %v1142_v0, %v2322_v53  ;;  %v1151_v15 = vmul.f32 %v1143_v26, %v2325_v41  ;;  %v971_v20 = vadd.f32 1.0, %v1731_v9  ;;  %1270 = vmatpush.msra.mxu0 %v872_v22  ;;  %v984_v56 = vmul.f32 %v976_v29, %v2216_v45 }
  0xfd   : > { %v1040_v21 = vmul.f32 %v1032_v10, %v2331_v51  ;;  %v1041_v30 = vmul.f32 %v1033_v61, %v2334_v58  ;;  %v978_v33 = vmul.f32 0.5, %v970_v12  ;;  %1290 = vmatpush.msra.mxu1 %v873_v43  ;;  %1732 = vtanh.f32 %v953_v54 }
  0xfe   : > { %v979_v44 = vmul.f32 0.5, %v971_v20  ;;  %v974_v26 = vmul.f32 0.5, %v966_v6  ;;  %v1158_v2 = vmul.f32 0.044715, %v1150_v14  ;;  %v2359_v3 = vmul.f32 0.044715, %v1151_v15  ;;  %1271 = vmatpush.msra.mxu0 %v2284_v18 }
  0xff   : > { %v1048_v17 = vmul.f32 0.044715, %v1040_v21  ;;  %v1049_v60 = vmul.f32 0.044715, %v1041_v30  ;;  %v697_v59 = vpop.f32.mrf.mxu2  ;;  %v726_v0 = vpop.f32.mrf.mxu3  ;;  %v986_v52 = vmul.f32 %v978_v33, %v2257_v24  ;;  %1291 = vmatpush.msra.mxu1 %v2287_v27  ;;  %v951_v12 = vmul.f32 0.7978846, %v2239_v4 }
 0x100   : > { %v2362_v9 = vadd.f32 %v2175_v47, %v697_v59  ;;  %v2365_v22 = vadd.f32 %v2175_v47, %v726_v0  ;;  %v642_v45 = vpop.f32.mrf.mxu0  ;;  %v671_v43 = vpop.f32.mrf.mxu1  ;;  %1272 = vmatpush.msra.mxu0 %v2248_v16  ;;  %v987_v61 = vmul.f32 %v979_v44, %v2260_v36  ;;  %v982_v29 = vmul.f32 %v974_v26, %v2185_v62 }
 0x101   : > { %v1056_v34 = vadd.f32 %v1048_v17, %v2331_v51  ;;  %v1057_v10 = vadd.f32 %v1049_v60, %v2334_v58  ;;  %v2372_v24 = vadd.f32 %v2195_v7, %v642_v45  ;;  %v2375_v6 = vadd.f32 %v2195_v7, %v671_v43  ;;  %1309 = vmatpush.msra.mxu2 %v986_v52 }
 0x102   : > { %v1144_v47 = vmul.f32 %v2362_v9, %v2362_v9  ;;  %v1145_v18 = vmul.f32 %v2365_v22, %v2365_v22  ;;  %1292 = vmatpush.msra.mxu1 %v2251_v31  ;;  %v964_v14 = vadd.f32 1.0, %v2253_v32  ;;  %1329 = vmatpush.msra.mxu3 %v987_v61  ;;  %1734 = vtanh.f32 %v951_v12 }
 0x103   : > { %v1034_v27 = vmul.f32 %v2372_v24, %v2372_v24  ;;  %v1035_v7 = vmul.f32 %v2375_v6, %v2375_v6  ;;  %v1733_v15 = vpop.eup %1732  ;;  %1310 = vmatpush.msra.mxu2 %v984_v56  ;;  %v1064_v4 = vmul.f32 0.7978846, %v1056_v34  ;;  %1736 = vtanh.f32 %v2213_v35  ;;  %v2408_v35 = vld [vmem:[%s2512_s5] sm:$0xf] }
 0x104   : > { %v1152_v16 = vmul.f32 %v1144_v47, %v2362_v9  ;;  %v1153_v20 = vmul.f32 %v1145_v18, %v2365_v22  ;;  %v969_v21 = vadd.f32 1.0, %v1733_v15  ;;  %v972_v30 = vmul.f32 0.5, %v964_v14  ;;  %1628 = vmatmul.msk.f32.vlgmr.msra.gmra.mxu0 %vm1253_vm2, %v2408_v35  ;;  %1629 = vmatmul.msk.f32.vlgmr.msra.gmra.mxu1 %vm1253_vm2, %v2408_v35 }
 0x105   : > { %v1042_v36 = vmul.f32 %v1034_v27, %v2372_v24  ;;  %v1043_v54 = vmul.f32 %v1035_v7, %v2375_v6  ;;  %1311 = vmatpush.msra.mxu2 %v982_v29  ;;  %v1065_v62 = vmul.f32 0.7978846, %v1057_v10  ;;  %v1166_v0 = vadd.f32 %v1158_v2, %v2322_v53 }
 0x106   : > { %v1160_v31 = vmul.f32 0.044715, %v1152_v16  ;;  %v1161_v33 = vmul.f32 0.044715, %v1153_v20  ;;  %v977_v17 = vmul.f32 0.5, %v969_v21  ;;  %v980_v56 = vmul.f32 %v972_v30, %v2163_v39 }
 0x107   : > { %v1050_v32 = vmul.f32 0.044715, %v1042_v36  ;;  %v1051_v44 = vmul.f32 0.044715, %v1043_v54  ;;  %v700_v60 = vpop.f32.mrf.mxu2  ;;  %v729_v59 = vpop.f32.mrf.mxu3  ;;  %1738 = vtanh.f32 %v1064_v4  ;;  %v1062_v29 = vmul.f32 0.7978846, %v2350_v55 }
 0x108   : > { %v1168_v52 = vadd.f32 %v1160_v31, %v2362_v9  ;;  %v2400_v26 = vadd.f32 %v2243_v11, %v700_v60  ;;  %v2403_v45 = vadd.f32 %v2243_v11, %v729_v59  ;;  %v985_v39 = vmul.f32 %v977_v17, %v2219_v46  ;;  %1312 = vmatpush.msra.mxu2 %v980_v56  ;;  %v1735_v2 = vpop.eup %1734 }
 0x109   : > { %v1058_v43 = vadd.f32 %v1050_v32, %v2372_v24  ;;  %v1059_v34 = vadd.f32 %v1051_v44, %v2375_v6  ;;  %1740 = vtanh.f32 %v1065_v62  ;;  %v1169_v47 = vadd.f32 %v1161_v33, %v2365_v22  ;;  %1630 = vmatmul.msk.f32.vlgmr.msra.gmra.mxu2 %vm1253_vm2, %v2408_v35  ;;  %v1737_v46 = vpop.eup %1736 }
 0x10a   : > { %v1146_v10 = vmul.f32 %v2400_v26, %v2400_v26  ;;  %v1147_v11 = vmul.f32 %v2403_v45, %v2403_v45  ;;  %1330 = vmatpush.msra.mxu3 %v985_v39  ;;  %v967_v12 = vadd.f32 1.0, %v1735_v2  ;;  %v1063_v14 = vmul.f32 0.7978846, %v2355_v42 }
 0x10b   : > { %v1066_v18 = vmul.f32 0.7978846, %v1058_v43  ;;  %v1067_v61 = vmul.f32 0.7978846, %v1059_v34  ;;  %v965_v16 = vadd.f32 1.0, %v1737_v46  ;;  %v1167_v33 = vadd.f32 %v2359_v3, %v2325_v41 }
 0x10c   : > { %v1154_v27 = vmul.f32 %v1146_v10, %v2400_v26  ;;  %v1155_v7 = vmul.f32 %v1147_v11, %v2403_v45  ;;  %v975_v15 = vmul.f32 0.5, %v967_v12  ;;  %v1060_v20 = vmul.f32 0.7978846, %v2304_v57 }
 0x10d   : > { %1742 = vtanh.f32 %v1066_v18  ;;  %v1061_v54 = vmul.f32 0.7978846, %v2315_v1  ;;  %v1739_v21 = vpop.eup %1738  ;;  %v973_v42 = vmul.f32 0.5, %v965_v16  ;;  %v1176_v30 = vmul.f32 0.7978846, %v1168_v52 }
 0x10e   : > { %1744 = vtanh.f32 %v1067_v61  ;;  %v1162_v4 = vmul.f32 0.044715, %v1154_v27  ;;  %v1163_v36 = vmul.f32 0.044715, %v1155_v7  ;;  %v983_v55 = vmul.f32 %v975_v15, %v2187_v63 }
 0x10f   : > { %1746 = vtanh.f32 %v1062_v29  ;;  %v1741_v31 = vpop.eup %1740  ;;  %v1165_v57 = vadd.f32 %v2318_v23, %v2293_v38  ;;  %v981_v1 = vmul.f32 %v973_v42, %v2165_v40  ;;  %v1080_v44 = vadd.f32 1.0, %v1739_v21 }
 0x110   : > { %v1170_v62 = vadd.f32 %v1162_v4, %v2400_v26  ;;  %v1171_v32 = vadd.f32 %v1163_v36, %v2403_v45  ;;  %1748 = vtanh.f32 %v1063_v14  ;;  %1331 = vmatpush.msra.mxu3 %v983_v55  ;;  %v1177_v60 = vmul.f32 0.7978846, %v1169_v47 }
 0x111   : > { %1750 = vtanh.f32 %v1060_v20  ;;  %v1081_v3 = vadd.f32 1.0, %v1741_v31  ;;  %v1174_v56 = vmul.f32 0.7978846, %v1166_v0  ;;  %v1175_v23 = vmul.f32 0.7978846, %v1167_v33 }
 0x112   : > { %v1178_v63 = vmul.f32 0.7978846, %v1170_v62  ;;  %v1179_v17 = vmul.f32 0.7978846, %v1171_v32  ;;  %1752 = vtanh.f32 %v1061_v54  ;;  %1332 = vmatpush.msra.mxu3 %v981_v1  ;;  %v1088_v39 = vmul.f32 0.5, %v1080_v44 }
 0x113   : > { %v1743_v59 = vpop.eup %1742  ;;  %1754 = vtanh.f32 %v1176_v30  ;;  %1631 = vmatmul.msk.f32.vlgmr.msra.gmra.mxu3 %vm1253_vm2, %v2408_v35  ;;  %v1172_v2 = vmul.f32 0.7978846, %v2328_v5  ;;  %v1173_v18 = vmul.f32 0.7978846, %v1165_v57  ;;  %v1089_v12 = vmul.f32 0.5, %v1081_v3 }
 0x114   : > { %v1745_v52 = vpop.eup %1744  ;;  %1756 = vtanh.f32 %v1178_v63  ;;  %v1082_v43 = vadd.f32 1.0, %v1743_v59  ;;  %v1096_v36 = vmul.f32 %v1088_v39, %v2331_v51 }
 0x115   : > { %v1747_v34 = vpop.eup %1746  ;;  %1758 = vtanh.f32 %v1179_v17  ;;  %v1083_v40 = vadd.f32 1.0, %v1745_v52 }
 0x116   : > { %v1749_v10 = vpop.eup %1748  ;;  %v1090_v11 = vmul.f32 0.5, %v1082_v43  ;;  %v1078_v47 = vadd.f32 1.0, %v1747_v34  ;;  %1760 = vtanh.f32 %v1177_v60 }
 0x117   : > { %v1751_v61 = vpop.eup %1750  ;;  %v1091_v0 = vmul.f32 0.5, %v1083_v40  ;;  %v1079_v46 = vadd.f32 1.0, %v1749_v10  ;;  %1762 = vtanh.f32 %v1174_v56 }
 0x118   : > { %v1753_v27 = vpop.eup %1752  ;;  %v1098_v7 = vmul.f32 %v1090_v11, %v2372_v24  ;;  %v1086_v29 = vmul.f32 0.5, %v1078_v47  ;;  %v1076_v14 = vadd.f32 1.0, %v1751_v61  ;;  %1764 = vtanh.f32 %v1175_v23 }
 0x119   : > { %v1755_v15 = vpop.eup %1754  ;;  %v1099_v16 = vmul.f32 %v1091_v0, %v2375_v6  ;;  %v1087_v5 = vmul.f32 0.5, %v1079_v46  ;;  %v1077_v20 = vadd.f32 1.0, %v1753_v27  ;;  %1766 = vtanh.f32 %v1172_v2 }
 0x11a   : > { %v1757_v4 = vpop.eup %1756  ;;  %1349 = vmatpush.msrb.mxu0 %v1098_v7  ;;  %v1084_v54 = vmul.f32 0.5, %v1076_v14  ;;  %v1192_v21 = vadd.f32 1.0, %v1755_v15  ;;  %1768 = vtanh.f32 %v1173_v18  ;;  %v1097_v24 = vmul.f32 %v1089_v12, %v2334_v58 }
 0x11b   : > { %v1759_v55 = vpop.eup %1758  ;;  %1369 = vmatpush.msrb.mxu1 %v1099_v16  ;;  %v1085_v42 = vmul.f32 0.5, %v1077_v20  ;;  %v1194_v30 = vadd.f32 1.0, %v1757_v4  ;;  %v1094_v6 = vmul.f32 %v1086_v29, %v2295_v48  ;;  %v1095_v32 = vmul.f32 %v1087_v5, %v2297_v50 }
 0x11c   : > { %v1761_v31 = vpop.eup %1760  ;;  %1350 = vmatpush.msrb.mxu0 %v1096_v36  ;;  %v1195_v33 = vadd.f32 1.0, %v1759_v55  ;;  %v1200_v51 = vmul.f32 0.5, %v1192_v21  ;;  %v1092_v63 = vmul.f32 %v1084_v54, %v2264_v49  ;;  %v1428_v0 = vrot.slane %v2036_v13, 4 }
 0x11d   : > { %v1763_v62 = vpop.eup %1762  ;;  %1370 = vmatpush.msrb.mxu1 %v1097_v24  ;;  %v1202_v57 = vmul.f32 0.5, %v1194_v30  ;;  %v1193_v1 = vadd.f32 1.0, %v1761_v31  ;;  %v1093_v59 = vmul.f32 %v1085_v42, %v2266_v25  ;;  %v1444_v36 = vrot.slane %v2043_v19, 4 }
 0x11e   : > { %v1765_v44 = vpop.eup %1764  ;;  %1351 = vmatpush.msrb.mxu0 %v1094_v6  ;;  %v1203_v17 = vmul.f32 0.5, %v1195_v33  ;;  %v1190_v58 = vadd.f32 1.0, %v1763_v62  ;;  %v1208_v49 = vmul.f32 %v1200_v51, %v2362_v9 }
 0x11f   : > { %v1767_v60 = vpop.eup %1766  ;;  %1371 = vmatpush.msrb.mxu1 %v1095_v32  ;;  %v1210_v48 = vmul.f32 %v1202_v57, %v2400_v26  ;;  %v1201_v3 = vmul.f32 0.5, %v1193_v1  ;;  %v1191_v56 = vadd.f32 1.0, %v1765_v44 }
 0x120   : > { %v1769_v52 = vpop.eup %1768  ;;  %1352 = vmatpush.msrb.mxu0 %v1092_v63  ;;  %v1211_v50 = vmul.f32 %v1203_v17, %v2403_v45  ;;  %v1198_v43 = vmul.f32 0.5, %v1190_v58  ;;  %v1188_v23 = vadd.f32 1.0, %v1767_v60 }
 0x121   : > { %1372 = vmatpush.msrb.mxu1 %v1093_v59  ;;  %1389 = vmatpush.msrb.mxu2 %v1210_v48  ;;  %v1199_v34 = vmul.f32 0.5, %v1191_v56  ;;  %v1189_v40 = vadd.f32 1.0, %v1769_v52  ;;  %v1209_v39 = vmul.f32 %v1201_v3, %v2365_v22 }
 0x122   : > { %1409 = vmatpush.msrb.mxu3 %v1211_v50  ;;  %v1196_v25 = vmul.f32 0.5, %v1188_v23  ;;  %1632 = vmatmul.msk.f32.vlgmr.msrb.gmra.mxu0 %vm1253_vm2, %v2408_v35  ;;  %v1206_v26 = vmul.f32 %v1198_v43, %v2322_v53  ;;  %v1420_v53 = vrot.slane %v2029_v8, 4 }
 0x123   : > { %1390 = vmatpush.msrb.mxu2 %v1208_v49  ;;  %v1197_v2 = vmul.f32 0.5, %v1189_v40  ;;  %1633 = vmatmul.msk.f32.vlgmr.msrb.gmra.mxu1 %vm1253_vm2, %v2408_v35  ;;  %v1207_v45 = vmul.f32 %v1199_v34, %v2325_v41 }
 0x124   : > { %1410 = vmatpush.msrb.mxu3 %v1209_v39  ;;  %v1204_v9 = vmul.f32 %v1196_v25, %v2291_v37 }
 0x125   : > { %1391 = vmatpush.msrb.mxu2 %v1206_v26  ;;  %v1205_v22 = vmul.f32 %v1197_v2, %v2293_v38 }
 0x126   : > { %1411 = vmatpush.msrb.mxu3 %v1207_v45 }
 0x127   : > { %1392 = vmatpush.msrb.mxu2 %v1204_v9 }
 0x128   : > { %1412 = vmatpush.msrb.mxu3 %v1205_v22  ;;  %1634 = vmatmul.msk.f32.vlgmr.msrb.gmra.mxu2 %vm1253_vm2, %v2408_v35 }
 0x129   : > { %1635 = vmatmul.msk.f32.vlgmr.msrb.gmra.mxu3 %vm1253_vm2, %v2408_v35 }
 0x181   : > { %v1294_v10 = vpop.f32.mrf.mxu1  ;;  %v1274_v11 = vpop.f32.mrf.mxu0 }
 0x182   : > { %v1417_v41 = vsub.f32 %v2029_v8, %v1274_v11  ;;  %v1422_v47 = vsub.f32 %v1420_v53, %v1294_v10  ;;  %v1436_v8 = vrot.slane %v2058_v28, 4 }
 0x184   : > { %v1418_v37 = vmul.f32 %v1417_v41, %v1417_v41  ;;  %v1423_v61 = vmul.f32 %v1422_v47, %v1422_v47 }
 0x186   : > { %v1424_v46 = vadd.f32 %v1423_v61, %v1418_v37 }
 0x18c   : > { %v1314_v18 = vpop.f32.mrf.mxu2 }
 0x18d   : > { %v1425_v38 = vsub.f32 %v2036_v13, %v1314_v18 }
 0x18f   : > { %v1426_v27 = vmul.f32 %v1425_v38, %v1425_v38 }
 0x191   : > { %v1427_v29 = vadd.f32 %v1426_v27, %v1424_v46 }
 0x196   : > { %v1334_v12 = vpop.f32.mrf.mxu3 }
 0x197   : > { %v1430_v35 = vsub.f32 %v1428_v0, %v1334_v12 }
 0x199   : > { %v1431_v14 = vmul.f32 %v1430_v35, %v1430_v35 }
 0x19b   : > { %v1432_v5 = vadd.f32 %v1431_v14, %v1427_v29 }
 0x19f   : > { %v1354_v7 = vpop.f32.mrf.mxu0 }
 0x1a0   : > { %v1433_v15 = vsub.f32 %v2058_v28, %v1354_v7  ;;  %v1374_v16 = vpop.f32.mrf.mxu1 }
 0x1a1   : > { %v1438_v4 = vsub.f32 %v1436_v8, %v1374_v16 }
 0x1a2   : > { %v1434_v20 = vmul.f32 %v1433_v15, %v1433_v15 }
 0x1a3   : > { %v1439_v54 = vmul.f32 %v1438_v4, %v1438_v4 }
 0x1a4   : > { %v1435_v13 = vadd.f32 %v1434_v20, %v1432_v5 }
 0x1a6   : > { %v1440_v42 = vadd.f32 %v1439_v54, %v1435_v13 }
 0x1ab   : > { %v1394_v21 = vpop.f32.mrf.mxu2 }
 0x1ac   : > { %v1441_v55 = vsub.f32 %v2043_v19, %v1394_v21  ;;  %v1414_v24 = vpop.f32.mrf.mxu3 }
 0x1ad   : > { %v1446_v28 = vsub.f32 %v1444_v36, %v1414_v24 }
 0x1ae   : > { %v1442_v30 = vmul.f32 %v1441_v55, %v1441_v55 }
 0x1af   : > { %v1447_v31 = vmul.f32 %v1446_v28, %v1446_v28 }
 0x1b0   : > { %v1443_v6 = vadd.f32 %v1442_v30, %v1440_v42 }
 0x1b2   : > { %v1448_v33 = vadd.f32 %v1447_v31, %v1443_v6 }
 0x1b4   : > { %1449 = vst [vmem:[%s316_s1] sm:$0xf] %v1448_v33 }
 0x1b5   : > { %1827 = shalt.err (!%p1824_p5)
}
 0x1b6   : > { %1644 = dma.vmem_to_hbm [thread:$0]  (%p1957_p11), %s1464_s28, 64, %s1466_s17, %s1451_s25  }
 0x1b7 PF: > { %s1477_s11 = sand.u32 1, %s1854_s21   ;;  %p2521_p8 = scmp.ge.s32.totalorder %s1866_s24, 2 }
 0x1b8   : > { %s1478_s7 = scalar_lea.sflag [#allocation5], %s1477_s11 }
 0x1b9   : > { %p1651_p10 = pnand %p2521_p8, %p1961_p12 }
 0x1bb   : > { %p1652_p2 = pneg %p1651_p10 }
 0x1bd   : > { %1849 = dma.done.wait (%p1652_p2), %s1478_s7, 64  }
 0x1be   : > { %1851 = vsyncadd (%p1652_p2), %s1478_s7, 4294967232  ;;  %p19_p9 = scmp.ge.s32.totalorder %s1932_s27, 4   ;;  %s2522_s21 = smov %s1858_s22 }
 0x1bf   : > { %s2523_s22 = smov %s1862_s23  ;;  %s2524_s23 = smov %s1944_s30 }
 0x1c0   : > { %s2525_s24 = smov %s1932_s27  ;;  %21 = sbr.rel (!%p19_p9) target bundleno = 7 (0x7), region = 105 }
 0x1c5   :  { %1484 = vsyncpa [#allocation4], 1 }
 0x1c6   :  { %1486 = vsyncpa [#allocation4 + $0x1], 1 }
 0x1c7   :  { %1487 = vsyncpa [#allocation5], 1 }
 0x1c8   :  { %1489 = vsyncpa [#allocation5 + $0x1], 1 }

</bundles_post_ra>
